<compile_context>
chip_gen: v6e
topology: v6e:2x2x1
jax: 0.10.0
libtpu: 0.0.40
codegen_flags: <defaults>
</compile_context>

<pallas_src>
import functools

import jax
import jax.numpy as jnp
from jax import lax
from jax.experimental import pallas as pl
from jax.experimental.pallas import tpu as pltpu

_LANES = 128


def _encoder_kernel(x_ref, w_ref, b_ref, g_ref, beta_ref, o_ref, *, eps, d_out):
    x = x_ref[...].astype(jnp.float32)            # [TB, Din]
    w = w_ref[...].astype(jnp.float32)            # [Din, Dpad]  (cols >= d_out are 0)

    # Fused concat + Linear (concat done once on host; weight pre-transposed).
    y = jnp.dot(x, w, preferred_element_type=jnp.float32) + b_ref[...]   # [TB, Dpad]

    # LayerNorm over the true d_out features. Padded columns of y are exactly 0
    # (zero weight columns + zero bias), so sums over all lanes divided by d_out
    # give the correct mean; centered values are masked before the variance so
    # padded lanes contribute nothing.
    inv_d = jnp.float32(1.0 / d_out)
    mean = jnp.sum(y, axis=1, keepdims=True) * inv_d
    col = lax.broadcasted_iota(jnp.int32, y.shape, 1)
    cent = jnp.where(col < d_out, y - mean, 0.0)
    var = jnp.sum(cent * cent, axis=1, keepdims=True) * inv_d
    inv = lax.rsqrt(var + eps)                    # EUP rsqrt: no VALU divide
    ln = cent * (inv * g_ref[...]) + beta_ref[...]  # padded lanes -> 0

    # ReLU; padded lanes stay 0 and are sliced off in the wrapper.
    o_ref[...] = jnp.maximum(ln, 0.0).astype(o_ref.dtype)


def _pick_row_tile(B, block_rows):
    """Row tile: big enough to amortize grid-step overhead, >=2 steps when the
    batch is non-trivial (v7x megacore), multiple of 8 sublanes when tiling."""
    if B <= 16:
        return B                                   # single tiny block (full dim)
    if B <= block_rows:
        half = -(-B // 2)                          # ceil(B/2)
        half = -(-half // 8) * 8                   # round up to 8 sublanes
        return half if half < B else B
    return block_rows


def personal_vascular_encoder(personal, vascular, weight, bias, gamma, beta,
                              *, eps=1e-5, block_rows=4096):
    """personal: [B, Dp], vascular: [B, Dv], weight: [Dout, Dp+Dv] (PyTorch layout),
    bias/gamma/beta: [Dout]. Returns [B, Dout]."""
    B, Dp = personal.shape
    Bv, Dv = vascular.shape
    assert B == Bv
    Dout, Din = weight.shape
    assert Din == Dp + Dv

    d_pad = max(_LANES, ((Dout + _LANES - 1) // _LANES) * _LANES)

    # One-time host-side prep (tiny tensors): fuse the two activation streams,
    # pre-transpose the weight, zero-pad params to a lane-dense width.
    x = jnp.concatenate([personal, vascular], axis=1)                 # [B, Din]
    wt = jnp.transpose(weight)                                        # [Din, Dout]
    w_pad = jnp.zeros((Din, d_pad), wt.dtype).at[:, :Dout].set(wt)
    b_pad = jnp.zeros((1, d_pad), jnp.float32).at[0, :Dout].set(bias.astype(jnp.float32))
    g_pad = jnp.zeros((1, d_pad), jnp.float32).at[0, :Dout].set(gamma.astype(jnp.float32))
    be_pad = jnp.zeros((1, d_pad), jnp.float32).at[0, :Dout].set(beta.astype(jnp.float32))

    tb = _pick_row_tile(B, block_rows)
    grid = (pl.cdiv(B, tb),)       # ragged last block handled by Pallas, no jnp.pad

    out = pl.pallas_call(
        functools.partial(_encoder_kernel, eps=eps, d_out=Dout),
        out_shape=jax.ShapeDtypeStruct((B, d_pad), personal.dtype),
        grid=grid,
        in_specs=[
            pl.BlockSpec((tb, Din), lambda i: (i, 0)),       # fused activations
            pl.BlockSpec((Din, d_pad), lambda i: (0, 0)),    # weight, resident
            pl.BlockSpec((1, d_pad), lambda i: (0, 0)),      # bias
            pl.BlockSpec((1, d_pad), lambda i: (0, 0)),      # gamma
            pl.BlockSpec((1, d_pad), lambda i: (0, 0)),      # beta
        ],
        out_specs=pl.BlockSpec((tb, d_pad), lambda i: (i, 0)),
        compiler_params=pltpu.CompilerParams(
            dimension_semantics=("parallel",)),
    )(x, w_pad, b_pad, g_pad, be_pad)

    return out[:, :Dout]


def _reference(personal, vascular, weight, bias, gamma, beta, eps=1e-5):
    x = jnp.concatenate([personal, vascular], axis=1)
    y = x @ weight.T + bias
    mean = jnp.mean(y, axis=1, keepdims=True)
    var = jnp.mean((y - mean) ** 2, axis=1, keepdims=True)
    ln = (y - mean) / jnp.sqrt(var + eps) * gamma + beta
    return jnp.maximum(ln, 0.0)


if __name__ == "__main__":
    key = jax.random.PRNGKey(0)
    kp, kv, kw, kb, kg, kbe = jax.random.split(key, 6)

    B, Dp, Dv, Dout = 8, 4, 6, 10
    personal = jax.random.normal(kp, (B, Dp), dtype=jnp.float32)
    vascular = jax.random.normal(kv, (B, Dv), dtype=jnp.float32)
    weight = 0.3 * jax.random.normal(kw, (Dout, Dp + Dv), dtype=jnp.float32)
    bias = 0.1 * jax.random.normal(kb, (Dout,), dtype=jnp.float32)
    gamma = 1.0 + 0.1 * jax.random.normal(kg, (Dout,), dtype=jnp.float32)
    beta = 0.1 * jax.random.normal(kbe, (Dout,), dtype=jnp.float32)

    out = personal_vascular_encoder(personal, vascular, weight, bias, gamma, beta)
    jax.block_until_ready(out)

    ref = _reference(personal, vascular, weight, bias, gamma, beta)
    assert out.shape == (B, Dout), out.shape
    assert jnp.allclose(out, ref, atol=1e-5, rtol=1e-5), (out, ref)

    print("KERNEL_OK")
</pallas_src>

<mosaic_0001>
module attributes {stable_mosaic.version = 11 : i64} {
  func.func @_encoder_kernel(%arg0: i32, %arg1: memref<8x10xf32, #tpu.memory_space<vmem>>, %arg2: memref<10x128xf32, #tpu.memory_space<vmem>>, %arg3: memref<1x128xf32, #tpu.memory_space<vmem>>, %arg4: memref<1x128xf32, #tpu.memory_space<vmem>>, %arg5: memref<1x128xf32, #tpu.memory_space<vmem>>, %arg6: memref<8x128xf32, #tpu.memory_space<vmem>>) attributes {dimension_semantics = [#tpu.dimension_semantics<parallel>], iteration_bounds = array<i64: 1>, scalar_prefetch = 0 : i64, scratch_operands = 0 : i64, tpu.core_type = #tpu.core_type<tc>, window_params = [{transform_indices = @transform_0, window_bounds = array<i64: 8, 10>}, {pipeline_mode = #tpu.pipeline_mode<synchronous>, transform_indices = @transform_1, window_bounds = array<i64: 10, 128>}, {pipeline_mode = #tpu.pipeline_mode<synchronous>, transform_indices = @transform_2, window_bounds = array<i64: 1, 128>}, {pipeline_mode = #tpu.pipeline_mode<synchronous>, transform_indices = @transform_3, window_bounds = array<i64: 1, 128>}, {pipeline_mode = #tpu.pipeline_mode<synchronous>, transform_indices = @transform_4, window_bounds = array<i64: 1, 128>}, {transform_indices = @transform_5, window_bounds = array<i64: 8, 128>}]} {
    %c0 = arith.constant 0 : index
    %c0_0 = arith.constant 0 : index
    %0 = vector.load %arg1[%c0, %c0_0] : memref<8x10xf32, #tpu.memory_space<vmem>>, vector<8x10xf32>
    %c0_1 = arith.constant 0 : index
    %c0_2 = arith.constant 0 : index
    %1 = vector.load %arg2[%c0_1, %c0_2] : memref<10x128xf32, #tpu.memory_space<vmem>>, vector<10x128xf32>
    %cst = arith.constant dense<0.000000e+00> : vector<8x128xf32>
    %2 = tpu.matmul %0, %1, %cst {dimension_numbers = #tpu.dot_dimension_numbers<[1], [0], [0], [1], [0, 0, 1, 1], [], []>} : vector<8x10xf32>, vector<10x128xf32>, vector<8x128xf32> -> vector<8x128xf32>
    %c0_3 = arith.constant 0 : index
    %c0_4 = arith.constant 0 : index
    %3 = vector.load %arg3[%c0_3, %c0_4] : memref<1x128xf32, #tpu.memory_space<vmem>>, vector<1x128xf32>
    %4 = vector.broadcast %3 : vector<1x128xf32> to vector<8x128xf32>
    %5 = arith.addf %2, %4 : vector<8x128xf32>
    %cst_5 = arith.constant dense<0.000000e+00> : vector<8xf32>
    %6 = vector.multi_reduction <add>, %5, %cst_5 [1] : vector<8x128xf32> to vector<8xf32>
    %7 = vector.shape_cast %6 : vector<8xf32> to vector<8x1xf32>
    %cst_6 = arith.constant 1.000000e-01 : f32
    %8 = vector.broadcast %cst_6 : f32 to vector<8x1xf32>
    %9 = arith.mulf %7, %8 : vector<8x1xf32>
    %10 = tpu.iota {dimensions = array<i32: 1>} : vector<8x128xi32>
    %c10_i32 = arith.constant 10 : i32
    %11 = vector.broadcast %c10_i32 : i32 to vector<8x128xi32>
    %12 = arith.cmpi slt, %10, %11 : vector<8x128xi32>
    %13 = vector.broadcast %9 : vector<8x1xf32> to vector<8x128xf32>
    %14 = arith.subf %5, %13 : vector<8x128xf32>
    %cst_7 = arith.constant 0.000000e+00 : f32
    %15 = vector.broadcast %cst_7 : f32 to vector<8x128xf32>
    %16 = arith.select %12, %14, %15 : vector<8x128xi1>, vector<8x128xf32>
    %17 = arith.mulf %16, %16 : vector<8x128xf32>
    %cst_8 = arith.constant dense<0.000000e+00> : vector<8xf32>
    %18 = vector.multi_reduction <add>, %17, %cst_8 [1] : vector<8x128xf32> to vector<8xf32>
    %19 = vector.shape_cast %18 : vector<8xf32> to vector<8x1xf32>
    %cst_9 = arith.constant 1.000000e-01 : f32
    %20 = vector.broadcast %cst_9 : f32 to vector<8x1xf32>
    %21 = arith.mulf %19, %20 : vector<8x1xf32>
    %cst_10 = arith.constant 9.99999974E-6 : f32
    %22 = vector.broadcast %cst_10 : f32 to vector<8x1xf32>
    %23 = arith.addf %21, %22 : vector<8x1xf32>
    %24 = math.rsqrt %23 : vector<8x1xf32>
    %c0_11 = arith.constant 0 : index
    %c0_12 = arith.constant 0 : index
    %25 = vector.load %arg4[%c0_11, %c0_12] : memref<1x128xf32, #tpu.memory_space<vmem>>, vector<1x128xf32>
    %26 = vector.broadcast %24 : vector<8x1xf32> to vector<8x128xf32>
    %27 = vector.broadcast %25 : vector<1x128xf32> to vector<8x128xf32>
    %28 = arith.mulf %26, %27 : vector<8x128xf32>
    %29 = arith.mulf %16, %28 : vector<8x128xf32>
    %c0_13 = arith.constant 0 : index
    %c0_14 = arith.constant 0 : index
    %30 = vector.load %arg5[%c0_13, %c0_14] : memref<1x128xf32, #tpu.memory_space<vmem>>, vector<1x128xf32>
    %31 = vector.broadcast %30 : vector<1x128xf32> to vector<8x128xf32>
    %32 = arith.addf %29, %31 : vector<8x128xf32>
    %cst_15 = arith.constant 0.000000e+00 : f32
    %33 = vector.broadcast %cst_15 : f32 to vector<8x128xf32>
    %34 = arith.maximumf %32, %33 : vector<8x128xf32>
    %c0_16 = arith.constant 0 : index
    %c0_17 = arith.constant 0 : index
    %35 = vector.load %arg6[%c0_16, %c0_17] : memref<8x128xf32, #tpu.memory_space<vmem>>, vector<8x128xf32>
    tpu.vector_store %arg6[%c0_16, %c0_17], %34 {strides = array<i32>} : memref<8x128xf32, #tpu.memory_space<vmem>>, vector<8x128xf32>,
    return
  }
  func.func @transform_0(%arg0: i32) -> (i32, i32) {
    %c0_i32 = arith.constant 0 : i32
    %c0_i32_0 = arith.constant 0 : i32
    return %arg0, %c0_i32 : i32, i32
  }
  func.func @transform_1(%arg0: i32) -> (i32, i32) {
    %c0_i32 = arith.constant 0 : i32
    %c0_i32_0 = arith.constant 0 : i32
    %c0_i32_1 = arith.constant 0 : i32
    return %c0_i32, %c0_i32_0 : i32, i32
  }
  func.func @transform_2(%arg0: i32) -> (i32, i32) {
    %c0_i32 = arith.constant 0 : i32
    %c0_i32_0 = arith.constant 0 : i32
    %c0_i32_1 = arith.constant 0 : i32
    return %c0_i32, %c0_i32_0 : i32, i32
  }
  func.func @transform_3(%arg0: i32) -> (i32, i32) {
    %c0_i32 = arith.constant 0 : i32
    %c0_i32_0 = arith.constant 0 : i32
    %c0_i32_1 = arith.constant 0 : i32
    return %c0_i32, %c0_i32_0 : i32, i32
  }
  func.func @transform_4(%arg0: i32) -> (i32, i32) {
    %c0_i32 = arith.constant 0 : i32
    %c0_i32_0 = arith.constant 0 : i32
    %c0_i32_1 = arith.constant 0 : i32
    return %c0_i32, %c0_i32_0 : i32, i32
  }
  func.func @transform_5(%arg0: i32) -> (i32, i32) {
    %c0_i32 = arith.constant 0 : i32
    %c0_i32_0 = arith.constant 0 : i32
    return %arg0, %c0_i32 : i32, i32
  }
}

</mosaic_0001>

<bundles_post_ra>
// kernel: tpu_custom_call.1
= control target key start
LH: loop header
LB: loop body
LE: loop exit
PB: predicated region body
PF: predicated region fallthrough
CT: control target
= control target key end

     0   :  { %10 = vsyncpa [#allocation3], 0  ;;  %s329_s0 = inlined_call_operand.hbm [shape: f32[8,10], index: 0, kind: input, shape index: {}]   ;;  %s330_s1 = inlined_call_operand.hbm [shape: f32[10,128], index: 1, kind: input, shape index: {}]   ;;  %s331_s2 = inlined_call_operand.vmem [shape: f32[1,128], index: 2, kind: input, shape index: {}]   ;;  %s332_s3 = inlined_call_operand.vmem [shape: f32[1,128], index: 3, kind: input, shape index: {}]   ;;  %s333_s4 = inlined_call_operand.vmem [shape: f32[1,128], index: 4, kind: input, shape index: {}]   ;;  %s334_s5 = inlined_call_operand.hbm [shape: f32[8,128], index: 5, kind: output, shape index: {}]  }
   0x1   :  { %11 = vsyncpa [#allocation6], 0 }
   0x2   :  { %12 = vsyncpa [#allocation4], 0  ;;  %s274_s18 = smov [#allocation2]   ;;  %s275_s20 = smov [#allocation5]  }
   0x3   :  { %s19_s19 = sshll.u32 %s274_s18, 4  ;;  %s28_s21 = sshll.u32 %s275_s20, 4  ;;  %s20_s19 = int_to_ptr.vmem [resolvable:$true] %s19_s19  ;;  %s29_s21 = int_to_ptr.vmem [resolvable:$true] %s28_s21 }
   0x4   :  { %s216_s22 = scalar_lea.vmem %s20_s19, 128  ;;  %p221_p1 = scmp.lt.s32.totalorder %s20_s19, %s20_s19 }
   0x5   :  { %p217_p0 = scmp.ne.s32.totalorder %s20_s19, %s216_s22  ;;  %p222_p2 = scmp.lt.s32.totalorder %s216_s22, %s216_s22 }
   0x7   :  { %p223_p3 = por %p222_p2, %p221_p1 }
   0x9   :  { %p224_p4 = pnand %p223_p3, %p217_p0 }
   0xb   :  { %227 = shalt.err (!%p224_p4)
}
   0xc   :  { %22 = dma.hbm_to_vmem [thread:$0]  %s329_s0, 128, %s20_s19, [#allocation3]  }
   0xd   :  { %s236_s25 = scalar_lea.vmem %s29_s21, 256  ;;  %p241_p6 = scmp.lt.s32.totalorder %s29_s21, %s29_s21 }
   0xe   :  { %p237_p5 = scmp.ne.s32.totalorder %s29_s21, %s236_s25  ;;  %p242_p7 = scmp.lt.s32.totalorder %s236_s25, %s236_s25 }
  0x10   :  { %p243_p8 = por %p242_p7, %p241_p6 }
  0x12   :  { %p244_p9 = pnand %p243_p8, %p237_p5 }
  0x14   :  { %247 = shalt.err (!%p244_p9)
}
  0x15   :  { %s276_s26 = smov 128   ;;  %s277_s27 = smov 8  }
  0x16   :  { %34 = dma.hbm_to_vmem [thread:$0]  %s330_s1, 256, %s29_s21, [#allocation6], %s276_s26, %s276_s26, %s277_s27  }
  0x17   :  { %268 = dma.done.wait [#allocation3], 128  }
  0x18   :  { %269 = vsyncadd [#allocation3], 4294967168 }
  0x19   :  { %270 = dma.done.wait [#allocation6], 256  }
  0x1a   :  { %271 = vsyncadd [#allocation6], 4294967040  ;;  %v278_v0 = vmov 0.0   ;;  %vm279_vm0 = vmmov 0   ;;  %vm61_vm1 = vcmask 1041408   ;;  %v48_v2 = vld [vmem:[#allocation5] sm:$0xff]  ;;  %v138_v8 = vlaneseq }
  0x1b   :  { %192 = vmatprep.subr.mxu0 %v278_v0  ;;  %196 = vmatprep.mubr.msk.f32.mxu0 %vm279_vm0, %v278_v0  ;;  %v49_v1 = vld [vmem:[#allocation5 + $0x8] sm:$0x3]  ;;  %v47_v3 = vld [vmem:[#allocation2] sm:$0xff]  ;;  %vm57_vm2 = vcmask 80896   ;;  %s280_s8 = smov [#allocation7]  }
  0x1c   :  { %193 = vmatpush3.msk.msra.mxu0 %vm61_vm1, %v49_v1  ;;  %v184_v4 = vld [vmem:[%s331_s2] ss:$0 sm:$0xff]  ;;  %v139_v9 = vand.u32 127, %v138_v8  ;;  %s174_s9 = sshll.u32 %s280_s8, 4  ;;  %s175_s9 = int_to_ptr.vmem [resolvable:$true] %s174_s9 }
  0x1d   :  { %194 = vmatprep.subr.mxu0 %v278_v0  ;;  %v187_v18 = vld [vmem:[%s332_s3] ss:$0 sm:$0xff]  ;;  %s248_s10 = scalar_lea.vmem %s175_s9, 128  ;;  %p253_p11 = scmp.lt.s32.totalorder %s175_s9, %s175_s9 }
  0x1e   :  { %195 = vmatpush3.msra.mxu0 %v48_v2  ;;  %vm140_vm3 = vcmp.lt.s32.totalorder %v139_v9, 10  ;;  %v188_v21 = vld [vmem:[%s333_s4] ss:$0 sm:$0xff]  ;;  %p249_p10 = scmp.ne.s32.totalorder %s175_s9, %s248_s10  ;;  %p254_p12 = scmp.lt.s32.totalorder %s248_s10, %s248_s10 }
  0x1f   :  { %197 = vmatmul.mubr.msk.f32.vlgmr.msra.gmra.mxu0 %vm57_vm2, %v47_v3 }
  0x20   :  { %p255_p13 = por %p254_p12, %p253_p11 }
  0x22   :  { %p256_p0 = pnand %p255_p13, %p249_p10 }
  0xdf   :  { %v131_v5 = vpop.f32.mrf.mxu0 }
  0xe0   :  { %v132_v6 = vadd.f32 %v184_v4, %v131_v5 }
  0xe1   :  { %v198_v7 = vpop.f32.mrf.mxu0 }
  0xe2   :  { %135 = vadd.xlane.f32.xlu0 %v132_v6 }
 0x16b   :  { %v136_v10 = vpop.xlane.xlu0 %135 }
 0x16c   :  { %v137_v11 = vmul.f32 0.1, %v136_v10 }
 0x16e   :  { %v141_v12 = vsub.f32 %v132_v6, %v137_v11 }
 0x170   :  { %v142_v13 = vsel %vm140_vm3, %v141_v12, 0.0 }
 0x171   :  { %v143_v14 = vmul.f32 %v142_v13, %v142_v13 }
 0x173   :  { %144 = vadd.xlane.f32.xlu0 %v143_v14 }
 0x1fc   :  { %v145_v15 = vpop.xlane.xlu0 %144 }
 0x1fd   :  { %v146_v16 = vmul.f32 0.1, %v145_v15 }
 0x1ff   :  { %v147_v17 = vadd.f32 1e-05, %v146_v16 }
 0x201   :  { %206 = vrsqrt.f32 %v147_v17 }
 0x20e   :  { %v207_v19 = vpop.eup %206 }
 0x20f   :  { %v156_v20 = vmul.f32 %v207_v19, %v187_v18 }
 0x211   :  { %v157_v22 = vmul.f32 %v156_v20, %v142_v13 }
 0x213   :  { %v165_v23 = vadd.f32 %v188_v21, %v157_v22 }
 0x215   :  { %v166_v24 = vmax.f32 %v165_v23, 0.0 }
 0x217   :  { %167 = vst [vmem:[#allocation7] sm:$0xff] %v166_v24 }
 0x218   :  { %259 = shalt.err (!%p256_p0)
}
 0x219   :  { %177 = dma.vmem_to_hbm [thread:$0]  %s175_s9, 128, %s334_s5, [#allocation4]  }
 0x21a   :  { %272 = dma.done.wait [#allocation4], 128  }
 0x21b   :  { %273 = vsyncadd [#allocation4], 4294967168 }
 0x21c   :  { %181 = vsyncpa [#allocation3], 1 }
 0x21d   :  { %182 = vsyncpa [#allocation6], 1 }
 0x21e   :  { %183 = vsyncpa [#allocation4], 1 }

</bundles_post_ra>
